<compile_context>
chip_gen: v7x
topology: tpu7x:2x2x1
jax: 0.10.0
libtpu: 0.0.40
codegen_flags: <defaults>
</compile_context>

<pallas_src>
import jax
import jax.numpy as jnp
from jax.experimental import pallas as pl
from jax.experimental.pallas import tpu as pltpu


# ---------------------------------------------------------------------------
# Kernels
# ---------------------------------------------------------------------------
def mlp_kernel(x_ref, w1_ref, b1_ref, w2_ref, b2_ref, o_ref):
    """Fully fused MLP tile: out = relu(x @ w1t + b1) @ w2t + b2.

    w1t: (in_f, hidden), w2t: (hidden, out_f) -- pre-transposed in the wrapper,
    so both dots are plain [M,K]x[K,N] (no per-step weight transpose).
    """
    h = jnp.dot(x_ref[...], w1_ref[...], preferred_element_type=jnp.float32)
    h = jnp.maximum(h + b1_ref[...], 0.0)
    # Feed the second MXU pass with operands in the input dtype (fast bf16 path
    # when the model is bf16); accumulation stays f32.
    h = h.astype(x_ref.dtype)
    out = jnp.dot(h, w2_ref[...], preferred_element_type=jnp.float32)
    o_ref[...] = (out + b2_ref[...]).astype(o_ref.dtype)


def mlp_ktiled_kernel(x_ref, w1_ref, b1_ref, w2_ref, b2_ref, o_ref, acc_ref):
    """Hidden-tiled MLP: accumulate `out` over hidden slices.

    ReLU is elementwise in hidden, so computing h per hidden slice and
    accumulating the second matmul over slices is exact.
    """
    k = pl.program_id(1)

    @pl.when(k == 0)
    def _init():
        acc_ref[...] = jnp.zeros_like(acc_ref)

    h = jnp.dot(x_ref[...], w1_ref[...], preferred_element_type=jnp.float32)
    h = jnp.maximum(h + b1_ref[...], 0.0).astype(x_ref.dtype)
    acc_ref[...] += jnp.dot(h, w2_ref[...], preferred_element_type=jnp.float32)

    @pl.when(k == pl.num_programs(1) - 1)
    def _finalize():
        o_ref[...] = (acc_ref[...] + b2_ref[...]).astype(o_ref.dtype)


# ---------------------------------------------------------------------------
# Helpers
# ---------------------------------------------------------------------------
def _round_up(x, m):
    return (x + m - 1) // m * m


def _vmem_capacity_bytes():
    try:
        info = pltpu.get_tpu_info()
        cap = getattr(info, "vmem_capacity_bytes", None)
        if cap:
            return int(cap)
    except Exception:
        pass
    return 64 * 1024 * 1024  # conservative default: v7x per-TensorCore VMEM


def _cost_estimate(B, in_f, hidden, out_f, itemsize):
    flops = 2 * B * (in_f * hidden + hidden * out_f)
    bytes_accessed = itemsize * (
        B * in_f + hidden * in_f + hidden + out_f * hidden + out_f + B * out_f
    )
    return pl.CostEstimate(
        flops=flops, transcendentals=0, bytes_accessed=bytes_accessed
    )


def _weight_resident_call(xp, w1t, b1_2d, w2t, b2_2d, *, tile_b, grid_b,
                          cost, vmem_limit, single_buffer_weights):
    in_f = xp.shape[1]
    hidden = w1t.shape[1]
    out_f_p = w2t.shape[1]
    dtype = xp.dtype

    if single_buffer_weights:
        # Constant-index blocks never re-fetch: one VMEM buffer is enough and
        # halves the resident-weight footprint (matters most on v7x / 64 MiB).
        wmode = dict(pipeline_mode=pl.Buffered(1))
    else:
        wmode = {}

    return pl.pallas_call(
        mlp_kernel,
        out_shape=jax.ShapeDtypeStruct((grid_b * tile_b, out_f_p), dtype),
        grid=(grid_b,),
        in_specs=[
            pl.BlockSpec((tile_b, in_f), lambda i: (i, 0)),
            pl.BlockSpec((in_f, hidden), lambda i: (0, 0), **wmode),
            pl.BlockSpec((1, hidden), lambda i: (0, 0), **wmode),
            pl.BlockSpec((hidden, out_f_p), lambda i: (0, 0), **wmode),
            pl.BlockSpec((1, out_f_p), lambda i: (0, 0), **wmode),
        ],
        out_specs=pl.BlockSpec((tile_b, out_f_p), lambda i: (i, 0)),
        compiler_params=pltpu.CompilerParams(
            dimension_semantics=("parallel",),
            vmem_limit_bytes=vmem_limit,
        ),
        cost_estimate=cost,
    )(xp, w1t, b1_2d, w2t, b2_2d)


def _ktiled_call(xp, w1t, b1_2d, w2t, b2_2d, *, tile_b, grid_b, tile_h, grid_h,
                 cost, vmem_limit):
    in_f = xp.shape[1]
    out_f_p = w2t.shape[1]
    dtype = xp.dtype
    return pl.pallas_call(
        mlp_ktiled_kernel,
        out_shape=jax.ShapeDtypeStruct((grid_b * tile_b, out_f_p), dtype),
        grid=(grid_b, grid_h),
        in_specs=[
            pl.BlockSpec((tile_b, in_f), lambda i, k: (i, 0)),
            pl.BlockSpec((in_f, tile_h), lambda i, k: (0, k)),
            pl.BlockSpec((1, tile_h), lambda i, k: (0, k)),
            pl.BlockSpec((tile_h, out_f_p), lambda i, k: (k, 0)),
            pl.BlockSpec((1, out_f_p), lambda i, k: (0, 0)),
        ],
        out_specs=pl.BlockSpec((tile_b, out_f_p), lambda i, k: (i, 0)),
        scratch_shapes=[pltpu.VMEM((tile_b, out_f_p), jnp.float32)],
        compiler_params=pltpu.CompilerParams(
            dimension_semantics=("parallel", "arbitrary"),
            vmem_limit_bytes=vmem_limit,
        ),
        cost_estimate=cost,
    )(xp, w1t, b1_2d, w2t, b2_2d)


# ---------------------------------------------------------------------------
# Public wrapper (matches PyTorch nn.Linear semantics: y = x @ W.T + b)
# ---------------------------------------------------------------------------
def mlp_forward(x, w1, b1, w2, b2, *, force_ktiled=False):
    """x: (B, in_f); w1: (hidden, in_f); b1: (hidden,);
    w2: (out_f, hidden); b2: (out_f,)."""
    B, in_f = x.shape
    hidden = w1.shape[0]
    out_f = w2.shape[0]
    dtype = x.dtype
    itemsize = dtype.itemsize

    # Transpose weights ONCE in XLA so the kernel contracts [M,K]x[K,N]
    # (avoids per-grid-step XLU transpose of constant weight tiles).
    w1t = w1.T                      # (in_f, hidden)
    w2t = w2.T                      # (hidden, out_f)
    b1_2d = b1.reshape(1, hidden)
    b2_2d = b2.reshape(1, out_f)

    cost = _cost_estimate(B, in_f, hidden, out_f, itemsize)

    vmem_cap = _vmem_capacity_bytes()
    budget = vmem_cap // 2          # ~50% of physical VMEM for our residency

    weight_bytes = (in_f * hidden + hidden * out_f + hidden + out_f) * itemsize

    # ---------------- tiny fused path (single invocation, no grid) ----------
    fused_bytes = (weight_bytes
                   + (B * in_f + B * out_f) * itemsize
                   + B * hidden * 4 + B * out_f * 4)
    if not force_ktiled and B <= 128 and fused_bytes <= budget:
        return pl.pallas_call(
            mlp_kernel,
            out_shape=jax.ShapeDtypeStruct((B, out_f), dtype),
            in_specs=[pl.BlockSpec(memory_space=pltpu.VMEM)] * 5,
            out_specs=pl.BlockSpec(memory_space=pltpu.VMEM),
            cost_estimate=cost,
        )(x, w1t, b1_2d, w2t, b2_2d)

    # ---------------- streaming paths ---------------------------------------
    # Lane-dense output: pad out_f to a multiple of 128 (zero-pad weight/bias
    # columns) so output stores are unmasked full-lane vst; strip outside.
    out_f_p = max(_round_up(out_f, 128), 128)
    if out_f_p != out_f:
        w2t = jnp.pad(w2t, ((0, 0), (0, out_f_p - out_f)))
        b2_2d = jnp.pad(b2_2d, ((0, 0), (0, out_f_p - out_f)))
    weight_res_bytes = (in_f * hidden + hidden * out_f_p
                        + hidden + out_f_p) * itemsize

    b_aligned = _round_up(B, 8)

    def act_bytes(tb, th):
        # double-buffered x/out tiles + f32 intermediate h + f32 out staging
        return (2 * tb * (in_f + out_f_p) * itemsize
                + tb * th * 4 + tb * out_f_p * 4)

    # ---- weight-resident batch-streaming path ------------------------------
    tile_b = None
    if not force_ktiled:
        cands = [c for c in (1024, 512, 256, 128) if c <= b_aligned] or [b_aligned]
        for cand in cands:
            # x2 on weights: conservative (covers the double-buffered fallback).
            if 2 * weight_res_bytes + act_bytes(cand, hidden) <= budget:
                tile_b = cand
                break

    if tile_b is not None:
        grid_b = pl.cdiv(B, tile_b)
        # v7x megacore: keep the batch grid even so both TensorCores get equal
        # work (harmless on v5e/v6e).
        if grid_b > 1 and grid_b % 2 == 1 and tile_b >= 256:
            tile_b //= 2
            grid_b = pl.cdiv(B, tile_b)
        B_p = grid_b * tile_b
        xp = jnp.pad(x, ((0, B_p - B), (0, 0))) if B_p != B else x

        est = 2 * weight_res_bytes + act_bytes(tile_b, hidden)
        vmem_limit = int(min(vmem_cap * 9 // 10,
                             max(int(est * 1.4), 48 * 1024 * 1024)))
        try:
            out = _weight_resident_call(
                xp, w1t, b1_2d, w2t, b2_2d, tile_b=tile_b, grid_b=grid_b,
                cost=cost, vmem_limit=vmem_limit, single_buffer_weights=True)
        except Exception:
            # pipeline_mode=pl.Buffered(1) unsupported on this JAX/Mosaic:
            # fall back to default double-buffering of the constant blocks.
            out = _weight_resident_call(
                xp, w1t, b1_2d, w2t, b2_2d, tile_b=tile_b, grid_b=grid_b,
                cost=cost, vmem_limit=vmem_limit, single_buffer_weights=False)
        return out[:B, :out_f]

    # ---- hidden-tiled (K-tiled) path: weights streamed in hidden slices ----
    hidden_aligned = max(_round_up(hidden, 128), 128)
    tb_cands = [c for c in (512, 256, 128) if c <= b_aligned] or [b_aligned]
    th_cands = [c for c in (2048, 1024, 512, 256, 128)
                if c <= hidden_aligned] or [hidden_aligned]

    def ktiled_bytes(tb, th):
        # double-buffered x / w1-slice / b1-slice / w2-slice / out tiles +
        # f32 h slab + f32 accumulator
        return (2 * (tb * in_f + in_f * th + th + th * out_f_p
                     + out_f_p + tb * out_f_p) * itemsize
                + tb * th * 4 + tb * out_f_p * 4)

    tile_b, tile_h = tb_cands[-1], th_cands[-1]
    found = False
    for tb in tb_cands:
        for th in th_cands:
            if ktiled_bytes(tb, th) <= budget:
                tile_b, tile_h = tb, th
                found = True
                break
        if found:
            break
    # TODO(synk): if even the smallest (tile_b, tile_h) exceeds the budget an
    # additional out_f/in_f tiling level would be needed; we proceed with the
    # smallest tiles and rely on vmem_limit_bytes headroom.

    grid_b = pl.cdiv(B, tile_b)
    if grid_b > 1 and grid_b % 2 == 1 and tile_b >= 256:
        tile_b //= 2
        grid_b = pl.cdiv(B, tile_b)
    grid_h = pl.cdiv(hidden, tile_h)
    B_p = grid_b * tile_b
    H_p = grid_h * tile_h

    xp = jnp.pad(x, ((0, B_p - B), (0, 0))) if B_p != B else x
    if H_p != hidden:
        # Zero-padded hidden slices are exact: relu(0 + 0) = 0 contributes 0.
        w1t = jnp.pad(w1t, ((0, 0), (0, H_p - hidden)))
        b1_2d = jnp.pad(b1_2d, ((0, 0), (0, H_p - hidden)))
        w2t = jnp.pad(w2t, ((0, H_p - hidden), (0, 0)))

    est = ktiled_bytes(tile_b, tile_h)
    vmem_limit = int(min(vmem_cap * 9 // 10,
                         max(int(est * 1.4), 48 * 1024 * 1024)))
    out = _ktiled_call(xp, w1t, b1_2d, w2t, b2_2d,
                       tile_b=tile_b, grid_b=grid_b,
                       tile_h=tile_h, grid_h=grid_h,
                       cost=cost, vmem_limit=vmem_limit)
    return out[:B, :out_f]


def reference_forward(x, w1, b1, w2, b2):
    h = jnp.maximum(x @ w1.T + b1, 0.0)
    return h @ w2.T + b2


if __name__ == "__main__":
    # Shapes implied by the module: Linear(in_f -> hidden_f), Linear(hidden_f -> out_f)
    batch, in_f, hidden_f, out_f = 8, 32, 64, 16

    key = jax.random.PRNGKey(0)
    kx, kw1, kw2, kx2, kw3, kw4 = jax.random.split(key, 6)

    x = jax.random.normal(kx, (batch, in_f), dtype=jnp.float32)
    # Deterministic kaiming_normal-style init (std = sqrt(2 / fan_in)), bias 0,
    # matching MLP.init_params(method='kaiming_normal').
    w1 = jax.random.normal(kw1, (hidden_f, in_f), jnp.float32) * jnp.sqrt(2.0 / in_f)
    b1 = jnp.zeros((hidden_f,), jnp.float32)
    w2 = jax.random.normal(kw2, (out_f, hidden_f), jnp.float32) * jnp.sqrt(2.0 / hidden_f)
    b2 = jnp.zeros((out_f,), jnp.float32)

    # 1) Tiny fused path.
    out = jax.block_until_ready(mlp_forward(x, w1, b1, w2, b2))
    ref = reference_forward(x, w1, b1, w2, b2)
    assert out.shape == (batch, out_f)
    assert jnp.allclose(out, ref, atol=2e-5, rtol=1e-5)

    # 2) Weight-resident streaming path: ragged batch (padded with pl.cdiv)
    #    and lane-dense padded output (16 -> 128, stripped outside).
    big_b = 1000
    xb = jax.random.normal(kx2, (big_b, in_f), dtype=jnp.float32)
    out_b = jax.block_until_ready(mlp_forward(xb, w1, b1, w2, b2))
    ref_b = reference_forward(xb, w1, b1, w2, b2)
    assert out_b.shape == (big_b, out_f)
    assert jnp.allclose(out_b, ref_b, atol=2e-5, rtol=1e-5)

    # 3) Hidden-tiled accumulator path (forced): hidden=384 -> two 256-wide
    #    hidden slices with zero padding, f32 accumulator + pl.when finalize.
    hb, hf = 24, 384
    xk = jax.random.normal(kx, (hb, in_f), dtype=jnp.float32)
    w1k = jax.random.normal(kw3, (hf, in_f), jnp.float32) * jnp.sqrt(2.0 / in_f)
    b1k = jnp.zeros((hf,), jnp.float32)
    w2k = jax.random.normal(kw4, (out_f, hf), jnp.float32) * jnp.sqrt(2.0 / hf)
    b2k = jnp.zeros((out_f,), jnp.float32)
    out_k = jax.block_until_ready(
        mlp_forward(xk, w1k, b1k, w2k, b2k, force_ktiled=True))
    ref_k = reference_forward(xk, w1k, b1k, w2k, b2k)
    assert out_k.shape == (hb, out_f)
    assert jnp.allclose(out_k, ref_k, atol=1e-4, rtol=1e-5)

    print("KERNEL_OK")
</pallas_src>

<mosaic_0001>
module attributes {stable_mosaic.version = 11 : i64} {
  func.func @mlp_kernel(%arg0: memref<8x32xf32, #tpu.memory_space<vmem>>, %arg1: memref<32x64xf32, #tpu.memory_space<vmem>>, %arg2: memref<1x64xf32, #tpu.memory_space<vmem>>, %arg3: memref<64x16xf32, #tpu.memory_space<vmem>>, %arg4: memref<1x16xf32, #tpu.memory_space<vmem>>, %arg5: memref<8x16xf32, #tpu.memory_space<vmem>>) attributes {dimension_semantics = [], scalar_prefetch = 0 : i64, scratch_operands = 0 : i64, tpu.core_type = #tpu.core_type<tc>} {
    %c0 = arith.constant 0 : index
    %c0_0 = arith.constant 0 : index
    %0 = vector.load %arg0[%c0, %c0_0] : memref<8x32xf32, #tpu.memory_space<vmem>>, vector<8x32xf32>
    %c0_1 = arith.constant 0 : index
    %c0_2 = arith.constant 0 : index
    %1 = vector.load %arg1[%c0_1, %c0_2] : memref<32x64xf32, #tpu.memory_space<vmem>>, vector<32x64xf32>
    %cst = arith.constant dense<0.000000e+00> : vector<8x64xf32>
    %2 = tpu.matmul %0, %1, %cst {dimension_numbers = #tpu.dot_dimension_numbers<[1], [0], [0], [1], [0, 0, 1, 1], [], []>} : vector<8x32xf32>, vector<32x64xf32>, vector<8x64xf32> -> vector<8x64xf32>
    %c0_3 = arith.constant 0 : index
    %c0_4 = arith.constant 0 : index
    %3 = vector.load %arg2[%c0_3, %c0_4] : memref<1x64xf32, #tpu.memory_space<vmem>>, vector<1x64xf32>
    %4 = vector.broadcast %3 : vector<1x64xf32> to vector<8x64xf32>
    %5 = arith.addf %2, %4 : vector<8x64xf32>
    %cst_5 = arith.constant 0.000000e+00 : f32
    %6 = vector.broadcast %cst_5 : f32 to vector<8x64xf32>
    %7 = arith.maximumf %5, %6 : vector<8x64xf32>
    %c0_6 = arith.constant 0 : index
    %c0_7 = arith.constant 0 : index
    %8 = vector.load %arg3[%c0_6, %c0_7] : memref<64x16xf32, #tpu.memory_space<vmem>>, vector<64x16xf32>
    %cst_8 = arith.constant dense<0.000000e+00> : vector<8x16xf32>
    %9 = tpu.matmul %7, %8, %cst_8 {dimension_numbers = #tpu.dot_dimension_numbers<[1], [0], [0], [1], [0, 0, 1, 1], [], []>} : vector<8x64xf32>, vector<64x16xf32>, vector<8x16xf32> -> vector<8x16xf32>
    %c0_9 = arith.constant 0 : index
    %c0_10 = arith.constant 0 : index
    %10 = vector.load %arg4[%c0_9, %c0_10] : memref<1x16xf32, #tpu.memory_space<vmem>>, vector<1x16xf32>
    %11 = vector.broadcast %10 : vector<1x16xf32> to vector<8x16xf32>
    %12 = arith.addf %9, %11 : vector<8x16xf32>
    %c0_11 = arith.constant 0 : index
    %c0_12 = arith.constant 0 : index
    %13 = vector.load %arg5[%c0_11, %c0_12] : memref<8x16xf32, #tpu.memory_space<vmem>>, vector<8x16xf32>
    tpu.vector_store %arg5[%c0_11, %c0_12], %12 {strides = array<i32>} : memref<8x16xf32, #tpu.memory_space<vmem>>, vector<8x16xf32>,
    return
  }
}

</mosaic_0001>

<bundles_post_ra>
// kernel: tpu_custom_call.1
= control target key start
LH: loop header
LB: loop body
LE: loop exit
PB: predicated region body
PF: predicated region fallthrough
CT: control target
= control target key end

     0   :  { %v307_v3 = vmov 0.0|0.0   ;;  %vm308_vm0 = vmmov 0   ;;  %v309_v6 = vmov 0.0   ;;  %s398_s0 = inlined_call_operand.vmem [shape: f32[8,32], index: 0, kind: input, shape index: {}]   ;;  %s399_s1 = inlined_call_operand.vmem [shape: f32[32,64], index: 1, kind: input, shape index: {}]   ;;  %s400_s2 = inlined_call_operand.vmem [shape: f32[1,64], index: 2, kind: input, shape index: {}]   ;;  %s401_s3 = inlined_call_operand.vmem [shape: f32[64,16], index: 3, kind: input, shape index: {}]   ;;  %s402_s4 = inlined_call_operand.vmem [shape: f32[1,16], index: 4, kind: input, shape index: {}]   ;;  %s403_s5 = inlined_call_operand.hbm [shape: f32[8,16], index: 5, kind: output, shape index: {}]  }
   0x1   :  { %v22_v0 = vld [vmem:[%s399_s1] sm:$0xff]  ;;  %v23_v1 = vld [vmem:[%s399_s1 + $0x8] sm:$0xff]  ;;  %v24_v2 = vld [vmem:[%s399_s1 + $0x10] sm:$0xff]  ;;  %261 = vmatprep.subr.bf16.mxu0 %v307_v3  ;;  %239 = vmatprep.mubr.msk.f32.mxu0 %vm308_vm0, %v309_v6 }
   0x2   :  { %v262_v4 = vpack.c.bf16 %v23_v1, %v22_v0  ;;  %v25_v5 = vld [vmem:[%s399_s1 + $0x18] sm:$0xff]  ;;  %v108_v7 = vld [vmem:[%s401_s3] sm:$0xff]  ;;  %267 = vmatprep.subr.bf16.mxu1 %v307_v3  ;;  %v109_v8 = vld [vmem:[%s401_s3 + $0x8] sm:$0xff]  ;;  %258 = vmatprep.mubr.msk.f32.mxu1 %vm308_vm0, %v309_v6 }
   0x3   :  { %v110_v9 = vld [vmem:[%s401_s3 + $0x10] sm:$0xff]  ;;  %v111_v10 = vld [vmem:[%s401_s3 + $0x18] sm:$0xff]  ;;  %v265_v11 = vpack.c.bf16 %v25_v5, %v24_v2  ;;  %v268_v12 = vpack.c.bf16 %v109_v8, %v108_v7 }
   0x4   :  { %263 = vmatpush3.bf16.msra.mxu0 %v262_v4 }
   0x5   :  { %264 = vmatprep.subr.bf16.mxu0 %v307_v3 }
   0x6   :  { %10 = vsyncpa [#allocation3], 0  ;;  %269 = vmatpush3.bf16.msra.mxu1 %v268_v12  ;;  %v271_v13 = vpack.c.bf16 %v111_v10, %v110_v9  ;;  %v112_v14 = vld [vmem:[%s401_s3 + $0x20] sm:$0xff]  ;;  %v113_v15 = vld [vmem:[%s401_s3 + $0x28] sm:$0xff]  ;;  %vm33_vm1 = vcmask 261120   ;;  %vm123_vm2 = vcmask 523264  }
   0x7   :  { %270 = vmatprep.subr.bf16.mxu1 %v307_v3  ;;  %v21_v16 = vld [vmem:[%s398_s0] sm:$0xff]  ;;  %v274_v17 = vpack.c.bf16 %v113_v15, %v112_v14  ;;  %v114_v18 = vld [vmem:[%s401_s3 + $0x30] sm:$0xff]  ;;  %v115_v19 = vld [vmem:[%s401_s3 + $0x38] sm:$0xff]  ;;  %s310_s21 = smov [#allocation2]   ;;  %vm197_vm3 = vcmask 130048  }
   0x8   :  { %266 = vmatpush3.bf16.msra.mxu0 %v265_v11  ;;  %v277_v20 = vpack.c.bf16 %v115_v19, %v114_v18  ;;  %v213_v21 = vld [vmem:[%s400_s2] ss:$0 sm:$0xff]  ;;  %s205_s22 = sshll.u32 %s310_s21, 4  ;;  %s206_s22 = int_to_ptr.vmem [resolvable:$true] %s205_s22 }
   0x9   :  { %v215_v26 = vld [vmem:[%s402_s4] ss:$0 sm:$0xff]  ;;  %s283_s3 = scalar_lea.vmem %s206_s22, 128  ;;  %p288_p1 = scmp.lt.s32.totalorder %s206_s22, %s206_s22 }
   0xa   :  { %272 = vmatpush3.bf16.msra.mxu1 %v271_v13  ;;  %p284_p0 = scmp.ne.s32.totalorder %s206_s22, %s283_s3  ;;  %p289_p2 = scmp.lt.s32.totalorder %s283_s3, %s283_s3 }
   0xb   :  { %240 = vmatmul.mubr.msk.f32.vlgmr.msra.gmra.mrb[0].mxu0 %vm33_vm1, %v21_v16  ;;  %273 = vmatprep.subr.bf16.mxu1 %v307_v3 }
   0xc   :  { %p290_p3 = por %p289_p2, %p288_p1 }
   0xe   :  { %275 = vmatpush3.bf16.msra.mxu1 %v274_v17  ;;  %p291_p4 = pnand %p290_p3, %p284_p0 }
   0xf   :  { %276 = vmatprep.subr.bf16.mxu1 %v307_v3 }
  0x12   :  { %278 = vmatpush3.bf16.msra.mxu1 %v277_v20 }
  0xde   :  { %v103_v22 = vpop.f32.mrb[0].mxu0 }
  0xdf   :  { %v104_v23 = vadd.f32 %v213_v21, %v103_v22  ;;  %v241_v24 = vpop.f32.mrb[1].mxu0 }
  0xe1   :  { %v107_v25 = vmax.f32 %v104_v23, 0.0 }
  0xe3   :  { %259 = vmatmul.mubr.msk.f32.vlgmr.msra.gmra.mrb[0].mxu1 %vm123_vm2, %v107_v25 }
 0x1b6   :  { %v193_v27 = vpop.f32.mrb[0].mxu1 }
 0x1b7   :  { %v194_v28 = vadd.f32 %v215_v26, %v193_v27  ;;  %v260_v29 = vpop.f32.mrb[1].mxu1 }
 0x1b9   :  { %198 = vst.msk [vmem:[#allocation2] sm:$0xff] %vm197_vm3, %v194_v28 }
 0x1ba   :  { %294 = shalt.err (!%p291_p4)
}
 0x1bb   :  { %s295_s24 = scalar_lea.hbm %s403_s5, 128 }
 0x1bc   :  { %p296_p5 = scmp.ne.s32.totalorder %s403_s5, %s295_s24  ;;  %p299_p6 = scmp.lt.u32.totalorder %s295_s24, %s403_s5 }
 0x1be   :  { %p301_p7 = pnand %p299_p6, %p296_p5 }
 0x1c0   :  { %304 = shalt.err (!%p301_p7)
}
 0x1c1   :  { %208 = dma.vmem_to_hbm [thread:$0]  %s206_s22, 128, %s403_s5, [#allocation3]  }
 0x1c2   :  { %305 = dma.done.wait [#allocation3], 128  }
 0x1c3   :  { %306 = vsyncadd [#allocation3], 4294967168 }
 0x1c4   :  { %212 = vsyncpa [#allocation3], 1 }

</bundles_post_ra>
